<compile_context>
chip_gen: v7x
topology: tpu7x:2x2x1
jax: 0.10.0
libtpu: 0.0.40
codegen_flags: <defaults>
</compile_context>

<pallas_src>
import jax
import jax.numpy as jnp
from jax.experimental import pallas as pl
from jax.experimental.pallas import tpu as pltpu

_LANE = 128
_SUBLANE = 8


def _reproj_kernel(params_ref, in_ref, out_ref):
    # in_ref (9, rows, 128): rows of per-point data, each a dense (rows, 128) tile.
    #   0..2 = pts (x, y, z); 3..4 = kp_A (u, v); 5..6 = kp_B (u, v);
    #   7 = kp_A depth; 8 = kp_B depth.
    # params_ref (SMEM, 16 scalars): [tx, ty, tz, r00..r22 (row-major), fx, fy, cx, cy]
    x = in_ref[0]
    y = in_ref[1]
    z = in_ref[2]

    fx = params_ref[12]
    fy = params_ref[13]
    cx = params_ref[14]
    cy = params_ref[15]

    # ---- frame A: pose_frameA is identity SE3 ----
    inv_xA = pl.reciprocal(x)  # exact; keeps error well inside tolerance at fx ~ 200
    out_ref[0] = fx * y * inv_xA + cx - in_ref[3]
    out_ref[1] = fy * z * inv_xA + cy - in_ref[4]
    out_ref[2] = jnp.abs(x - in_ref[7])

    # ---- frame B: p_cam = pose_B.Inv().Act(p) = R^T (p - t), R precomputed in wrapper ----
    tx = params_ref[0]
    ty = params_ref[1]
    tz = params_ref[2]
    r00 = params_ref[3]
    r01 = params_ref[4]
    r02 = params_ref[5]
    r10 = params_ref[6]
    r11 = params_ref[7]
    r12 = params_ref[8]
    r20 = params_ref[9]
    r21 = params_ref[10]
    r22 = params_ref[11]

    px = x - tx
    py = y - ty
    pz = z - tz
    xB = r00 * px + r10 * py + r20 * pz
    yB = r01 * px + r11 * py + r21 * pz
    zB = r02 * px + r12 * py + r22 * pz

    inv_xB = pl.reciprocal(xB)
    out_ref[3] = fx * yB * inv_xB + cx - in_ref[5]
    out_ref[4] = fy * zB * inv_xB + cy - in_ref[6]
    out_ref[5] = jnp.abs(xB - in_ref[8])


def _num_tensorcores_per_chip():
    """Rough chip detection: v7x has 2 TensorCores per chip, v5e/v6e have 1."""
    try:
        kind = jax.devices()[0].device_kind.lower()
    except Exception:  # pragma: no cover - defensive
        return 1
    return 2 if "7" in kind else 1


def _pick_block_rows(n_rows):
    """Choose (rows-per-block, grid-steps) for the (rows, 128)-dense layout.

    Block = (9, rows, 128) input + (6, rows, 128) output, f32 => 7680 bytes per row.
    Single-TC chips (v5e/v6e): one big block when it fits comfortably in scoped VMEM.
    Dual-TC chips (v7x): an even number of steps >= 4 so both cores stay busy/pipelined.
    """
    bytes_per_row = (9 + 6) * _LANE * 4
    budget = 8 * 1024 * 1024  # per-block byte cap, incl. double buffering when gridded

    def fits(rows, steps):
        buffered = 1 if steps == 1 else 2
        return rows * bytes_per_row * buffered <= budget

    if _num_tensorcores_per_chip() >= 2:
        for steps in (4, 6, 8, 12, 16, 24, 32, 2):
            if n_rows % steps == 0:
                rows = n_rows // steps
                if rows % _SUBLANE == 0 and fits(rows, steps):
                    return rows, steps

    if fits(n_rows, 1):
        return n_rows, 1

    steps = 2
    while steps <= n_rows:
        if n_rows % steps == 0:
            rows = n_rows // steps
            if rows % _SUBLANE == 0 and fits(rows, steps):
                return rows, steps
        steps += 1
    return n_rows, 1  # fallback: single block


def _pose_intrinsics_params(pose_B, K):
    """pose_B (7,) = [tx,ty,tz,qx,qy,qz,qw], K (3,3) -> (16,) f32 SMEM params vector."""
    tx, ty, tz = pose_B[0], pose_B[1], pose_B[2]
    qx, qy, qz, qw = pose_B[3], pose_B[4], pose_B[5], pose_B[6]
    R_flat = jnp.stack([
        1.0 - 2.0 * (qy * qy + qz * qz), 2.0 * (qx * qy - qz * qw), 2.0 * (qx * qz + qy * qw),
        2.0 * (qx * qy + qz * qw), 1.0 - 2.0 * (qx * qx + qz * qz), 2.0 * (qy * qz - qx * qw),
        2.0 * (qx * qz - qy * qw), 2.0 * (qy * qz + qx * qw), 1.0 - 2.0 * (qx * qx + qy * qy),
    ])
    intr = jnp.stack([K[0, 0], K[1, 1], K[0, 2], K[1, 2]])
    return jnp.concatenate([jnp.stack([tx, ty, tz]), R_flat, intr]).astype(jnp.float32)


def reproj_ba_forward_soa(packed, params):
    """SoA-native entry point (preferred for performance).

    packed: (9, N) f32 slab [x,y,z, kpA_u,kpA_v, kpB_u,kpB_v, dA, dB]; params: (16,) f32.
    Returns the (6, N) residual slab (rows 0..2 = loss_frameA, rows 3..5 = loss_frameB).
    """
    nine, N = packed.shape
    assert nine == 9
    assert N % _LANE == 0, "N must be a multiple of 128 (lane width)"
    n_rows = N // _LANE
    rows, steps = _pick_block_rows(n_rows)

    packed3 = packed.reshape(9, n_rows, _LANE)  # metadata-only reshape to sublane-dense form

    out = pl.pallas_call(
        _reproj_kernel,
        out_shape=jax.ShapeDtypeStruct((6, n_rows, _LANE), jnp.float32),
        grid_spec=pltpu.PrefetchScalarGridSpec(
            num_scalar_prefetch=0,
            grid=(steps,),
            in_specs=[
                pl.BlockSpec(memory_space=pltpu.MemorySpace.SMEM),        # pose R+t+intrinsics
                pl.BlockSpec((9, rows, _LANE), lambda i: (0, i, 0)),      # packed per-point data
            ],
            out_specs=pl.BlockSpec((6, rows, _LANE), lambda i: (0, i, 0)),
        ),
        compiler_params=pltpu.CompilerParams(dimension_semantics=("parallel",)),
        cost_estimate=pl.CostEstimate(flops=40 * N, transcendentals=2 * N,
                                      bytes_accessed=60 * N),
    )(params, packed3)
    return out.reshape(6, N)


def reproj_ba_forward(pts_Tw, pose_B, kp_A, kp_B, kp_A_d, kp_B_d, K):
    """Module-compatible wrapper matching ReprojBA.forward().

    pts_Tw (N,3), pose_B (7,)=[t,qx,qy,qz,qw], kp_A/kp_B (N,2), kp_*_d (1,N), K (3,3)
    -> (2N, 3).  For best end-to-end HBM traffic, keep inputs in SoA form and consume
    the (6, N) slab from reproj_ba_forward_soa directly instead of this wrapper.
    """
    N = pts_Tw.shape[0]
    f32 = jnp.float32
    packed = jnp.concatenate(
        [pts_Tw.T.astype(f32),   # (3, N)
         kp_A.T.astype(f32),     # (2, N)
         kp_B.T.astype(f32),     # (2, N)
         kp_A_d.astype(f32),     # (1, N)
         kp_B_d.astype(f32)],    # (1, N)
        axis=0)                  # (9, N)
    params = _pose_intrinsics_params(pose_B, K)

    out6 = reproj_ba_forward_soa(packed, params)
    # rows 0..2 = loss_frameA (u,v,d), rows 3..5 = loss_frameB  ->  (2N, 3)
    return jnp.transpose(out6.reshape(2, 3, N), (0, 2, 1)).reshape(2 * N, 3)


def _reference(pts, pose, kp_A, kp_B, dA, dB, K):
    fx, fy, cx, cy = K[0, 0], K[1, 1], K[0, 2], K[1, 2]

    def proj_ned(p):
        return jnp.stack([fx * p[:, 1] / p[:, 0] + cx,
                          fy * p[:, 2] / p[:, 0] + cy], axis=1)

    t, q = pose[:3], pose[3:]
    qx, qy, qz, qw = q[0], q[1], q[2], q[3]
    R = jnp.array([[1 - 2 * (qy * qy + qz * qz), 2 * (qx * qy - qz * qw), 2 * (qx * qz + qy * qw)],
                   [2 * (qx * qy + qz * qw), 1 - 2 * (qx * qx + qz * qz), 2 * (qy * qz - qx * qw)],
                   [2 * (qx * qz - qy * qw), 2 * (qy * qz + qx * qw), 1 - 2 * (qx * qx + qy * qy)]],
                  dtype=jnp.float32)
    pB = (pts - t) @ R  # rows = R^T (p - t)
    loss_A = jnp.concatenate([proj_ned(pts) - kp_A,
                              jnp.abs(pts[:, 0] - dA[0])[:, None]], axis=1)
    loss_B = jnp.concatenate([proj_ned(pB) - kp_B,
                              jnp.abs(pB[:, 0] - dB[0])[:, None]], axis=1)
    return jnp.concatenate([loss_A, loss_B], axis=0)


if __name__ == "__main__":
    key = jax.random.PRNGKey(0)
    N = 256  # number of matched keypoints (multiple of 128)
    k_pts, k_lat, k_kpa, k_kpb, k_da, k_db = jax.random.split(key, 6)

    # 3D points in NED camera-A frame: x (forward depth) in [2, 10], y/z in [-3, 3]
    depth = jax.random.uniform(k_pts, (N, 1), jnp.float32, 2.0, 10.0)
    lateral = jax.random.uniform(k_lat, (N, 2), jnp.float32, -3.0, 3.0)
    pts_Tw = jnp.concatenate([depth, lateral], axis=1)  # (N, 3)

    # pose_frameB as SE3 [tx, ty, tz, qx, qy, qz, qw] (small motion, normalized quat)
    q = jnp.array([0.05, -0.03, 0.02, 1.0], jnp.float32)
    q = q / jnp.linalg.norm(q)
    pose_B = jnp.concatenate([jnp.array([0.3, -0.2, 0.1], jnp.float32), q])

    kp_A = jax.random.uniform(k_kpa, (N, 2), jnp.float32, 0.0, 255.0)
    kp_B = jax.random.uniform(k_kpb, (N, 2), jnp.float32, 0.0, 255.0)
    kp_A_depth = jax.random.uniform(k_da, (1, N), jnp.float32, 2.0, 10.0)
    kp_B_depth = jax.random.uniform(k_db, (1, N), jnp.float32, 2.0, 10.0)

    K = jnp.array([[200.0, 0.0, 128.0],
                   [0.0, 200.0, 96.0],
                   [0.0, 0.0, 1.0]], jnp.float32)

    out = reproj_ba_forward(pts_Tw, pose_B, kp_A, kp_B, kp_A_depth, kp_B_depth, K)
    out = jax.block_until_ready(out)

    ref = _reference(pts_Tw, pose_B, kp_A, kp_B, kp_A_depth, kp_B_depth, K)
    assert out.shape == (2 * N, 3), out.shape
    assert jnp.allclose(out, ref, rtol=1e-4, atol=1e-2), float(jnp.max(jnp.abs(out - ref)))
    print("KERNEL_OK")
</pallas_src>

<mosaic_0001>
module attributes {stable_mosaic.version = 11 : i64} {
  func.func @_reproj_kernel(%arg0: i32, %arg1: memref<16xf32, #tpu.memory_space<smem>>, %arg2: memref<9x2x128xf32, #tpu.memory_space<vmem>>, %arg3: memref<6x2x128xf32, #tpu.memory_space<vmem>>) attributes {dimension_semantics = [#tpu.dimension_semantics<parallel>], iteration_bounds = array<i64: 1>, scalar_prefetch = 0 : i64, scratch_operands = 0 : i64, tpu.core_type = #tpu.core_type<tc>, window_params = [{transform_indices = @transform_0, window_bounds = array<i64: 16>}, {transform_indices = @transform_1, window_bounds = array<i64: 9, 2, 128>}, {transform_indices = @transform_2, window_bounds = array<i64: 6, 2, 128>}]} {
    %c0 = arith.constant 0 : index
    %c0_0 = arith.constant 0 : index
    %c0_1 = arith.constant 0 : index
    %0 = vector.load %arg2[%c0, %c0_0, %c0_1] : memref<9x2x128xf32, #tpu.memory_space<vmem>>, vector<1x2x128xf32>
    %1 = vector.shape_cast %0 : vector<1x2x128xf32> to vector<2x128xf32>
    %c1 = arith.constant 1 : index
    %c0_2 = arith.constant 0 : index
    %c0_3 = arith.constant 0 : index
    %2 = vector.load %arg2[%c1, %c0_2, %c0_3] : memref<9x2x128xf32, #tpu.memory_space<vmem>>, vector<1x2x128xf32>
    %3 = vector.shape_cast %2 : vector<1x2x128xf32> to vector<2x128xf32>
    %c2 = arith.constant 2 : index
    %c0_4 = arith.constant 0 : index
    %c0_5 = arith.constant 0 : index
    %4 = vector.load %arg2[%c2, %c0_4, %c0_5] : memref<9x2x128xf32, #tpu.memory_space<vmem>>, vector<1x2x128xf32>
    %5 = vector.shape_cast %4 : vector<1x2x128xf32> to vector<2x128xf32>
    %c12 = arith.constant 12 : index
    %6 = memref.load %arg1[%c12] : memref<16xf32, #tpu.memory_space<smem>>
    %c13 = arith.constant 13 : index
    %7 = memref.load %arg1[%c13] : memref<16xf32, #tpu.memory_space<smem>>
    %c14 = arith.constant 14 : index
    %8 = memref.load %arg1[%c14] : memref<16xf32, #tpu.memory_space<smem>>
    %c15 = arith.constant 15 : index
    %9 = memref.load %arg1[%c15] : memref<16xf32, #tpu.memory_space<smem>>
    %10 = tpu.reciprocal %1 : vector<2x128xf32> -> vector<2x128xf32>
    %11 = vector.broadcast %6 : f32 to vector<2x128xf32>
    %12 = arith.mulf %11, %3 : vector<2x128xf32>
    %13 = arith.mulf %12, %10 : vector<2x128xf32>
    %14 = vector.broadcast %8 : f32 to vector<2x128xf32>
    %15 = arith.addf %13, %14 : vector<2x128xf32>
    %c3 = arith.constant 3 : index
    %c0_6 = arith.constant 0 : index
    %c0_7 = arith.constant 0 : index
    %16 = vector.load %arg2[%c3, %c0_6, %c0_7] : memref<9x2x128xf32, #tpu.memory_space<vmem>>, vector<1x2x128xf32>
    %17 = vector.shape_cast %16 : vector<1x2x128xf32> to vector<2x128xf32>
    %18 = arith.subf %15, %17 : vector<2x128xf32>
    %c0_8 = arith.constant 0 : index
    %c0_9 = arith.constant 0 : index
    %c0_10 = arith.constant 0 : index
    %19 = vector.load %arg3[%c0_8, %c0_9, %c0_10] : memref<6x2x128xf32, #tpu.memory_space<vmem>>, vector<1x2x128xf32>
    %20 = vector.shape_cast %19 : vector<1x2x128xf32> to vector<2x128xf32>
    %21 = vector.shape_cast %18 : vector<2x128xf32> to vector<1x2x128xf32>
    tpu.vector_store %arg3[%c0_8, %c0_9, %c0_10], %21 {strides = array<i32>} : memref<6x2x128xf32, #tpu.memory_space<vmem>>, vector<1x2x128xf32>,
    %22 = vector.broadcast %7 : f32 to vector<2x128xf32>
    %23 = arith.mulf %22, %5 : vector<2x128xf32>
    %24 = arith.mulf %23, %10 : vector<2x128xf32>
    %25 = vector.broadcast %9 : f32 to vector<2x128xf32>
    %26 = arith.addf %24, %25 : vector<2x128xf32>
    %c4 = arith.constant 4 : index
    %c0_11 = arith.constant 0 : index
    %c0_12 = arith.constant 0 : index
    %27 = vector.load %arg2[%c4, %c0_11, %c0_12] : memref<9x2x128xf32, #tpu.memory_space<vmem>>, vector<1x2x128xf32>
    %28 = vector.shape_cast %27 : vector<1x2x128xf32> to vector<2x128xf32>
    %29 = arith.subf %26, %28 : vector<2x128xf32>
    %c1_13 = arith.constant 1 : index
    %c0_14 = arith.constant 0 : index
    %c0_15 = arith.constant 0 : index
    %30 = vector.load %arg3[%c1_13, %c0_14, %c0_15] : memref<6x2x128xf32, #tpu.memory_space<vmem>>, vector<1x2x128xf32>
    %31 = vector.shape_cast %30 : vector<1x2x128xf32> to vector<2x128xf32>
    %32 = vector.shape_cast %29 : vector<2x128xf32> to vector<1x2x128xf32>
    tpu.vector_store %arg3[%c1_13, %c0_14, %c0_15], %32 {strides = array<i32>} : memref<6x2x128xf32, #tpu.memory_space<vmem>>, vector<1x2x128xf32>,
    %c7 = arith.constant 7 : index
    %c0_16 = arith.constant 0 : index
    %c0_17 = arith.constant 0 : index
    %33 = vector.load %arg2[%c7, %c0_16, %c0_17] : memref<9x2x128xf32, #tpu.memory_space<vmem>>, vector<1x2x128xf32>
    %34 = vector.shape_cast %33 : vector<1x2x128xf32> to vector<2x128xf32>
    %35 = arith.subf %1, %34 : vector<2x128xf32>
    %36 = math.absf %35 : vector<2x128xf32>
    %c2_18 = arith.constant 2 : index
    %c0_19 = arith.constant 0 : index
    %c0_20 = arith.constant 0 : index
    %37 = vector.load %arg3[%c2_18, %c0_19, %c0_20] : memref<6x2x128xf32, #tpu.memory_space<vmem>>, vector<1x2x128xf32>
    %38 = vector.shape_cast %37 : vector<1x2x128xf32> to vector<2x128xf32>
    %39 = vector.shape_cast %36 : vector<2x128xf32> to vector<1x2x128xf32>
    tpu.vector_store %arg3[%c2_18, %c0_19, %c0_20], %39 {strides = array<i32>} : memref<6x2x128xf32, #tpu.memory_space<vmem>>, vector<1x2x128xf32>,
    %c0_21 = arith.constant 0 : index
    %40 = memref.load %arg1[%c0_21] : memref<16xf32, #tpu.memory_space<smem>>
    %c1_22 = arith.constant 1 : index
    %41 = memref.load %arg1[%c1_22] : memref<16xf32, #tpu.memory_space<smem>>
    %c2_23 = arith.constant 2 : index
    %42 = memref.load %arg1[%c2_23] : memref<16xf32, #tpu.memory_space<smem>>
    %c3_24 = arith.constant 3 : index
    %43 = memref.load %arg1[%c3_24] : memref<16xf32, #tpu.memory_space<smem>>
    %c4_25 = arith.constant 4 : index
    %44 = memref.load %arg1[%c4_25] : memref<16xf32, #tpu.memory_space<smem>>
    %c5 = arith.constant 5 : index
    %45 = memref.load %arg1[%c5] : memref<16xf32, #tpu.memory_space<smem>>
    %c6 = arith.constant 6 : index
    %46 = memref.load %arg1[%c6] : memref<16xf32, #tpu.memory_space<smem>>
    %c7_26 = arith.constant 7 : index
    %47 = memref.load %arg1[%c7_26] : memref<16xf32, #tpu.memory_space<smem>>
    %c8 = arith.constant 8 : index
    %48 = memref.load %arg1[%c8] : memref<16xf32, #tpu.memory_space<smem>>
    %c9 = arith.constant 9 : index
    %49 = memref.load %arg1[%c9] : memref<16xf32, #tpu.memory_space<smem>>
    %c10 = arith.constant 10 : index
    %50 = memref.load %arg1[%c10] : memref<16xf32, #tpu.memory_space<smem>>
    %c11 = arith.constant 11 : index
    %51 = memref.load %arg1[%c11] : memref<16xf32, #tpu.memory_space<smem>>
    %52 = vector.broadcast %40 : f32 to vector<2x128xf32>
    %53 = arith.subf %1, %52 : vector<2x128xf32>
    %54 = vector.broadcast %41 : f32 to vector<2x128xf32>
    %55 = arith.subf %3, %54 : vector<2x128xf32>
    %56 = vector.broadcast %42 : f32 to vector<2x128xf32>
    %57 = arith.subf %5, %56 : vector<2x128xf32>
    %58 = vector.broadcast %43 : f32 to vector<2x128xf32>
    %59 = arith.mulf %58, %53 : vector<2x128xf32>
    %60 = vector.broadcast %46 : f32 to vector<2x128xf32>
    %61 = arith.mulf %60, %55 : vector<2x128xf32>
    %62 = arith.addf %59, %61 : vector<2x128xf32>
    %63 = vector.broadcast %49 : f32 to vector<2x128xf32>
    %64 = arith.mulf %63, %57 : vector<2x128xf32>
    %65 = arith.addf %62, %64 : vector<2x128xf32>
    %66 = vector.broadcast %44 : f32 to vector<2x128xf32>
    %67 = arith.mulf %66, %53 : vector<2x128xf32>
    %68 = vector.broadcast %47 : f32 to vector<2x128xf32>
    %69 = arith.mulf %68, %55 : vector<2x128xf32>
    %70 = arith.addf %67, %69 : vector<2x128xf32>
    %71 = vector.broadcast %50 : f32 to vector<2x128xf32>
    %72 = arith.mulf %71, %57 : vector<2x128xf32>
    %73 = arith.addf %70, %72 : vector<2x128xf32>
    %74 = vector.broadcast %45 : f32 to vector<2x128xf32>
    %75 = arith.mulf %74, %53 : vector<2x128xf32>
    %76 = vector.broadcast %48 : f32 to vector<2x128xf32>
    %77 = arith.mulf %76, %55 : vector<2x128xf32>
    %78 = arith.addf %75, %77 : vector<2x128xf32>
    %79 = vector.broadcast %51 : f32 to vector<2x128xf32>
    %80 = arith.mulf %79, %57 : vector<2x128xf32>
    %81 = arith.addf %78, %80 : vector<2x128xf32>
    %82 = tpu.reciprocal %65 : vector<2x128xf32> -> vector<2x128xf32>
    %83 = vector.broadcast %6 : f32 to vector<2x128xf32>
    %84 = arith.mulf %83, %73 : vector<2x128xf32>
    %85 = arith.mulf %84, %82 : vector<2x128xf32>
    %86 = vector.broadcast %8 : f32 to vector<2x128xf32>
    %87 = arith.addf %85, %86 : vector<2x128xf32>
    %c5_27 = arith.constant 5 : index
    %c0_28 = arith.constant 0 : index
    %c0_29 = arith.constant 0 : index
    %88 = vector.load %arg2[%c5_27, %c0_28, %c0_29] : memref<9x2x128xf32, #tpu.memory_space<vmem>>, vector<1x2x128xf32>
    %89 = vector.shape_cast %88 : vector<1x2x128xf32> to vector<2x128xf32>
    %90 = arith.subf %87, %89 : vector<2x128xf32>
    %c3_30 = arith.constant 3 : index
    %c0_31 = arith.constant 0 : index
    %c0_32 = arith.constant 0 : index
    %91 = vector.load %arg3[%c3_30, %c0_31, %c0_32] : memref<6x2x128xf32, #tpu.memory_space<vmem>>, vector<1x2x128xf32>
    %92 = vector.shape_cast %91 : vector<1x2x128xf32> to vector<2x128xf32>
    %93 = vector.shape_cast %90 : vector<2x128xf32> to vector<1x2x128xf32>
    tpu.vector_store %arg3[%c3_30, %c0_31, %c0_32], %93 {strides = array<i32>} : memref<6x2x128xf32, #tpu.memory_space<vmem>>, vector<1x2x128xf32>,
    %94 = vector.broadcast %7 : f32 to vector<2x128xf32>
    %95 = arith.mulf %94, %81 : vector<2x128xf32>
    %96 = arith.mulf %95, %82 : vector<2x128xf32>
    %97 = vector.broadcast %9 : f32 to vector<2x128xf32>
    %98 = arith.addf %96, %97 : vector<2x128xf32>
    %c6_33 = arith.constant 6 : index
    %c0_34 = arith.constant 0 : index
    %c0_35 = arith.constant 0 : index
    %99 = vector.load %arg2[%c6_33, %c0_34, %c0_35] : memref<9x2x128xf32, #tpu.memory_space<vmem>>, vector<1x2x128xf32>
    %100 = vector.shape_cast %99 : vector<1x2x128xf32> to vector<2x128xf32>
    %101 = arith.subf %98, %100 : vector<2x128xf32>
    %c4_36 = arith.constant 4 : index
    %c0_37 = arith.constant 0 : index
    %c0_38 = arith.constant 0 : index
    %102 = vector.load %arg3[%c4_36, %c0_37, %c0_38] : memref<6x2x128xf32, #tpu.memory_space<vmem>>, vector<1x2x128xf32>
    %103 = vector.shape_cast %102 : vector<1x2x128xf32> to vector<2x128xf32>
    %104 = vector.shape_cast %101 : vector<2x128xf32> to vector<1x2x128xf32>
    tpu.vector_store %arg3[%c4_36, %c0_37, %c0_38], %104 {strides = array<i32>} : memref<6x2x128xf32, #tpu.memory_space<vmem>>, vector<1x2x128xf32>,
    %c8_39 = arith.constant 8 : index
    %c0_40 = arith.constant 0 : index
    %c0_41 = arith.constant 0 : index
    %105 = vector.load %arg2[%c8_39, %c0_40, %c0_41] : memref<9x2x128xf32, #tpu.memory_space<vmem>>, vector<1x2x128xf32>
    %106 = vector.shape_cast %105 : vector<1x2x128xf32> to vector<2x128xf32>
    %107 = arith.subf %65, %106 : vector<2x128xf32>
    %108 = math.absf %107 : vector<2x128xf32>
    %c5_42 = arith.constant 5 : index
    %c0_43 = arith.constant 0 : index
    %c0_44 = arith.constant 0 : index
    %109 = vector.load %arg3[%c5_42, %c0_43, %c0_44] : memref<6x2x128xf32, #tpu.memory_space<vmem>>, vector<1x2x128xf32>
    %110 = vector.shape_cast %109 : vector<1x2x128xf32> to vector<2x128xf32>
    %111 = vector.shape_cast %108 : vector<2x128xf32> to vector<1x2x128xf32>
    tpu.vector_store %arg3[%c5_42, %c0_43, %c0_44], %111 {strides = array<i32>} : memref<6x2x128xf32, #tpu.memory_space<vmem>>, vector<1x2x128xf32>,
    return
  }
  func.func @transform_0(%arg0: i32) -> i32 {
    %c0_i32 = arith.constant 0 : i32
    %c0_i32_0 = arith.constant 0 : i32
    return %c0_i32 : i32
  }
  func.func @transform_1(%arg0: i32) -> (i32, i32, i32) {
    %c0_i32 = arith.constant 0 : i32
    %c0_i32_0 = arith.constant 0 : i32
    %c0_i32_1 = arith.constant 0 : i32
    return %c0_i32, %arg0, %c0_i32_0 : i32, i32, i32
  }
  func.func @transform_2(%arg0: i32) -> (i32, i32, i32) {
    %c0_i32 = arith.constant 0 : i32
    %c0_i32_0 = arith.constant 0 : i32
    %c0_i32_1 = arith.constant 0 : i32
    return %c0_i32, %arg0, %c0_i32_0 : i32, i32, i32
  }
}

</mosaic_0001>

<bundles_post_ra>
// kernel: tpu_custom_call.1
= control target key start
LH: loop header
LB: loop body
LE: loop exit
PB: predicated region body
PF: predicated region fallthrough
CT: control target
= control target key end

     0   :  { %7 = vsyncpa [#allocation5], 0  ;;  %s337_s0 = inlined_call_operand.hbm [shape: f32[16], index: 0, kind: input, shape index: {}]   ;;  %s338_s1 = inlined_call_operand.hbm [shape: f32[9,2,128], index: 1, kind: input, shape index: {}]   ;;  %s339_s2 = inlined_call_operand.hbm [shape: f32[6,2,128], index: 2, kind: output, shape index: {}]  }
   0x1   :  { %8 = vsyncpa [#allocation3], 0 }
   0x2   :  { %9 = vsyncpa [#allocation4], 0  ;;  %s179_s11 = scalar_lea.hbm %s337_s0, 16 }
   0x3   :  { %p180_p0 = scmp.ne.s32.totalorder %s337_s0, %s179_s11  ;;  %p183_p1 = scmp.lt.u32.totalorder %s179_s11, %s337_s0 }
   0x5   :  { %p185_p2 = pnand %p183_p1, %p180_p0 }
   0x7   :  { %188 = shalt.err (!%p185_p2)
}
   0x8   :  { %s239_s16 = smov [#allocation2]   ;;  %s240_s19 = smov [#allocation6]  }
   0x9   :  { %17 = dma.hbm_to_smem %s337_s0, 16, %s239_s16, [#allocation5]  }
   0xa   :  { %s23_s20 = sshll.u32 %s240_s19, 4  ;;  %s189_s23 = scalar_lea.hbm %s338_s1, 288  ;;  %s24_s20 = int_to_ptr.vmem [resolvable:$true] %s23_s20 }
   0xb   :  { %p190_p3 = scmp.ne.s32.totalorder %s338_s1, %s189_s23  ;;  %p193_p4 = scmp.lt.u32.totalorder %s189_s23, %s338_s1 }
   0xd   :  { %p195_p5 = pnand %p193_p4, %p190_p3 }
   0xf   :  { %198 = shalt.err (!%p195_p5)
}
  0x10   :  { %s199_s28 = scalar_lea.vmem %s24_s20, 288  ;;  %p204_p7 = scmp.lt.s32.totalorder %s24_s20, %s24_s20 }
  0x11   :  { %p200_p6 = scmp.ne.s32.totalorder %s24_s20, %s199_s28  ;;  %p205_p8 = scmp.lt.s32.totalorder %s199_s28, %s199_s28 }
  0x13   :  { %p206_p9 = por %p205_p8, %p204_p7 }
  0x15   :  { %p207_p10 = pnand %p206_p9, %p200_p6 }
  0x17   :  { %210 = shalt.err (!%p207_p10)
}
  0x18   :  { %s241_s0 = smov 32   ;;  %s242_s29 = smov 2  }
  0x19   :  { %29 = dma.hbm_to_vmem [thread:$0]  %s338_s1, 288, %s24_s20, [#allocation3], %s241_s0, %s241_s0, %s242_s29  }
  0x1a   :  { %233 = dma.done.wait [#allocation5], 16  }
  0x1b   :  { %234 = vsyncadd [#allocation5], 4294967280 }
  0x1c   :  { %235 = dma.done.wait [#allocation3], 288  }
  0x1d   :  { %236 = vsyncadd [#allocation3], 4294967008 }
  0x1e   :  { %36 = sfence }
  0x1f   :  { %v37_v0 = vld [vmem:[#allocation6] sm:$0x3]  ;;  %s286_s4 = sld [smem:[#allocation2 + $0xc]]  ;;  %s288_s5 = sld [smem:[#allocation2 + $0xe]]  ;;  %v67_v1 = vld [vmem:[#allocation6 + $0xe] sm:$0x3] }
  0x20   :  { %175 = vrcp.f32 %v37_v0  ;;  %s72_s6 = sld [smem:[#allocation2]]  ;;  %s159_s7 = sld [smem:[#allocation2 + $0x1]]  ;;  %v68_v2 = vsub.f32 %v37_v0, %v67_v1  ;;  %v39_v3 = vld [vmem:[#allocation6 + $0x2] sm:$0x3]  ;;  %v41_v11 = vld [vmem:[#allocation6 + $0x4] sm:$0x3] }
  0x21   :  { %s161_s8 = sld [smem:[#allocation2 + $0x3]]  ;;  %s290_s9 = sld [smem:[#allocation2 + $0x6]]  ;;  %v53_v29 = vld [vmem:[#allocation6 + $0x6] sm:$0x3]  ;;  %v62_v31 = vld [vmem:[#allocation6 + $0x8] sm:$0x3] }
  0x22   :  { %s292_s10 = sld [smem:[#allocation2 + $0xd]]  ;;  %s294_s1 = sld [smem:[#allocation2 + $0xf]]  ;;  %v69_v6 = vand.u32 2147483647, %v68_v2  ;;  %v132_v39 = vld [vmem:[#allocation6 + $0x10] sm:$0x3] }
  0x23   :  { %s160_s11 = sld [smem:[#allocation2 + $0x2]]  ;;  %s296_s12 = sld [smem:[#allocation2 + $0x9]]  ;;  %v119_v59 = vld [vmem:[#allocation6 + $0xa] sm:$0x3]  ;;  %v127_v60 = vld [vmem:[#allocation6 + $0xc] sm:$0x3] }
  0x24   :  { %s298_s13 = sld [smem:[#allocation2 + $0x4]]  ;;  %s301_s14 = sld [smem:[#allocation2 + $0x7]]  ;;  %71 = vst [vmem:[#allocation7 + $0x4] sm:$0x3] %v69_v6 }
  0x25   :  { %v47_v4 = vstv %s286_s4  ;;  %s303_s15 = sld [smem:[#allocation2 + $0xa]]  ;;  %s305_s16 = sld [smem:[#allocation2 + $0x5]]  ;;  %v50_v12 = vstv %s288_s5 }
  0x26   :  { %v84_v5 = vstv %s72_s6  ;;  %s307_s17 = sld [smem:[#allocation2 + $0x8]]  ;;  %v48_v7 = vmul.f32 %v47_v4, %v39_v3  ;;  %v86_v9 = vstv %s159_s7  ;;  %s309_s18 = sld [smem:[#allocation2 + $0xb]] }
  0x27   :  { %v85_v8 = vsub.f32 %v37_v0, %v84_v5  ;;  %v90_v10 = vstv %s161_s8  ;;  %v87_v13 = vsub.f32 %v39_v3, %v86_v9  ;;  %v92_v14 = vstv %s290_s9  ;;  %s243_s19 = smov [#allocation7]  }
  0x28   :  { %v56_v15 = vstv %s292_s10  ;;  %v59_v18 = vstv %s294_s1  ;;  %s142_s20 = sshll.u32 %s243_s19, 4  ;;  %s143_s20 = int_to_ptr.vmem [resolvable:$true] %s142_s20 }
  0x29   :  { %v91_v16 = vmul.f32 %v90_v10, %v85_v8  ;;  %v57_v17 = vmul.f32 %v56_v15, %v41_v11  ;;  %v88_v19 = vstv %s160_s11  ;;  %v93_v21 = vmul.f32 %v92_v14, %v87_v13  ;;  %s211_s21 = scalar_lea.vmem %s143_s20, 192  ;;  %p216_p12 = scmp.lt.s32.totalorder %s143_s20, %s143_s20 }
  0x2a   :  { %v176_v20 = vpop.eup %175  ;;  %v89_v22 = vsub.f32 %v41_v11, %v88_v19  ;;  %v95_v23 = vstv %s296_s12  ;;  %v98_v24 = vstv %s298_s13  ;;  %v100_v28 = vstv %s301_s14  ;;  %p212_p11 = scmp.ne.s32.totalorder %s143_s20, %s211_s21  ;;  %p217_p13 = scmp.lt.s32.totalorder %s211_s21, %s211_s21 }
  0x2b   :  { %v49_v25 = vmul.f32 %v176_v20, %v48_v7  ;;  %v58_v26 = vmul.f32 %v176_v20, %v57_v17  ;;  %v99_v27 = vmul.f32 %v98_v24, %v85_v8  ;;  %v94_v30 = vadd.f32 %v93_v21, %v91_v16 }
  0x2c   :  { %v96_v32 = vmul.f32 %v95_v23, %v89_v22  ;;  %v101_v33 = vmul.f32 %v100_v28, %v87_v13  ;;  %v103_v34 = vstv %s303_s15  ;;  %v106_v38 = vstv %s305_s16  ;;  %p218_p0 = por %p217_p13, %p216_p12 }
  0x2d   :  { %v51_v35 = vadd.f32 %v50_v12, %v49_v25  ;;  %v60_v36 = vadd.f32 %v59_v18, %v58_v26  ;;  %v104_v37 = vmul.f32 %v103_v34, %v89_v22  ;;  %v107_v42 = vmul.f32 %v106_v38, %v85_v8 }
  0x2e   :  { %v97_v40 = vadd.f32 %v96_v32, %v94_v30  ;;  %v102_v41 = vadd.f32 %v101_v33, %v99_v27  ;;  %v108_v43 = vstv %s307_s17  ;;  %v111_v47 = vstv %s309_s18  ;;  %p219_p1 = pnand %p218_p0, %p212_p11 }
  0x2f   :  { %v54_v44 = vsub.f32 %v51_v35, %v53_v29  ;;  %v63_v45 = vsub.f32 %v60_v36, %v62_v31  ;;  %v109_v46 = vmul.f32 %v108_v43, %v87_v13  ;;  %v112_v48 = vmul.f32 %v111_v47, %v89_v22 }
  0x30   :  { %177 = vrcp.f32 %v97_v40  ;;  %v133_v49 = vsub.f32 %v97_v40, %v132_v39  ;;  %v105_v52 = vadd.f32 %v104_v37, %v102_v41 }
  0x31   :  { %55 = vst [vmem:[#allocation7] sm:$0x3] %v54_v44  ;;  %65 = vst [vmem:[#allocation7 + $0x2] sm:$0x3] %v63_v45  ;;  %v110_v50 = vadd.f32 %v109_v46, %v107_v42 }
  0x32   :  { %v134_v51 = vand.u32 2147483647, %v133_v49  ;;  %v115_v54 = vmul.f32 %v105_v52, %v47_v4 }
  0x33   :  { %v113_v53 = vadd.f32 %v112_v48, %v110_v50 }
  0x34   :  { %136 = vst [vmem:[#allocation7 + $0xa] sm:$0x3] %v134_v51 }
  0x35   :  { %v123_v55 = vmul.f32 %v113_v53, %v56_v15 }
  0x3a   :  { %v178_v56 = vpop.eup %177 }
  0x3b   :  { %v116_v57 = vmul.f32 %v178_v56, %v115_v54  ;;  %v124_v58 = vmul.f32 %v178_v56, %v123_v55 }
  0x3d   :  { %v117_v61 = vadd.f32 %v116_v57, %v50_v12  ;;  %v125_v62 = vadd.f32 %v124_v58, %v59_v18 }
  0x3f   :  { %v120_v63 = vsub.f32 %v117_v61, %v119_v59  ;;  %v128_v0 = vsub.f32 %v125_v62, %v127_v60 }
  0x41   :  { %122 = vst [vmem:[#allocation7 + $0x6] sm:$0x3] %v120_v63  ;;  %130 = vst [vmem:[#allocation7 + $0x8] sm:$0x3] %v128_v0 }
  0x42   :  { %222 = shalt.err (!%p219_p1)
}
  0x43   :  { %s223_s24 = scalar_lea.hbm %s339_s2, 192 }
  0x44   :  { %p224_p2 = scmp.ne.s32.totalorder %s339_s2, %s223_s24  ;;  %p227_p3 = scmp.lt.u32.totalorder %s223_s24, %s339_s2 }
  0x46   :  { %p229_p4 = pnand %p227_p3, %p224_p2 }
  0x48   :  { %232 = shalt.err (!%p229_p4)
}
  0x49   :  { %148 = dma.vmem_to_hbm [thread:$0]  %s143_s20, 192, %s339_s2, [#allocation4], %s241_s0, %s241_s0, %s242_s29  }
  0x4a   :  { %237 = dma.done.wait [#allocation4], 192  }
  0x4b   :  { %238 = vsyncadd [#allocation4], 4294967104 }
  0x4c   :  { %152 = vsyncpa [#allocation3], 1 }
  0x4d   :  { %153 = vsyncpa [#allocation4], 1 }
  0x4e   :  { %154 = vsyncpa [#allocation5], 1 }

</bundles_post_ra>
